<compile_context>
chip_gen: v6e
topology: v6e:2x2x1
jax: 0.10.0
libtpu: 0.0.40
codegen_flags: <defaults>
</compile_context>

<pallas_src>
import functools

import numpy as np
import jax
import jax.numpy as jnp
from jax import lax
from jax.experimental import pallas as pl
from jax.experimental.pallas import tpu as pltpu


# ---------------------------------------------------------------------------
# Generation-aware sizing helpers.
# ---------------------------------------------------------------------------
def _tpu_info():
    """(vmem_capacity_bytes, has_bf16_valu) with conservative fallbacks."""
    kind = ""
    try:
        kind = jax.devices()[0].device_kind.lower()
    except Exception:
        pass
    vmem = 64 * 2**20 if "v7" in kind else 128 * 2**20
    try:
        vmem = int(pltpu.get_tpu_info().vmem_capacity_bytes)
    except Exception:
        pass
    bf16_valu = ("v6" in kind) or ("v7" in kind)   # v5e has no bf16 VALU
    return vmem, bf16_valu


def _vmem_limit_bytes(vmem_capacity):
    # Raise the scoped-VMEM limit above the 16/32 MiB defaults (review item)
    # while leaving headroom: <=56 MiB on 128-MiB parts, ~45% of VMEM on v7x.
    return int(min(vmem_capacity * 45 // 100, 56 * 2**20))


def _pick_tile(total, target, align=128):
    """Largest multiple of `align` that divides `total` and is <= target
    (never below `align`).  If `total` is not a multiple of `align` (tiny /
    odd demo shapes) fall back to one full block -- no silent creation of a
    non-divisor tile."""
    if total % align != 0 or total <= align:
        return total
    t = max(min(target, total), align)
    t -= t % align
    while total % t != 0:
        t -= align
    return t


# ---------------------------------------------------------------------------
# Kernel 1: layer 1 (INPUT_DIM -> 256), K-streamed, N split across TCs.
# ---------------------------------------------------------------------------
def _enc1_kernel(x_ref, w1_ref, b1_ref, h_ref, acc_ref):
    k = pl.program_id(1)

    @pl.when(k == 0)
    def _init():
        acc_ref[...] = jnp.zeros_like(acc_ref)

    # bf16 x / W1 tiles; bf16 products are exact, accumulated in f32.
    acc_ref[...] += jnp.dot(x_ref[...], w1_ref[...],
                            preferred_element_type=jnp.float32)

    @pl.when(k == pl.num_programs(1) - 1)
    def _finish():
        h_ref[...] = jnp.maximum(acc_ref[...] + b1_ref[...], 0.0)


# ---------------------------------------------------------------------------
# Kernel 2: the 9 tiny layers -> theta (1, 6) (final ReLU per the spec).
# ---------------------------------------------------------------------------
def _mlp_tail_kernel(h_ref, *refs):
    *wb, theta_ref = refs
    h = h_ref[...]
    for li in range(len(wb) // 2):
        w = wb[2 * li][...]
        b = wb[2 * li + 1][...]
        h = jnp.maximum(jnp.dot(h, w, preferred_element_type=jnp.float32) + b, 0.0)
    theta_ref[...] = h


def _compute_theta(x, params, *, tk=None):
    """10-layer MLP -> theta (1, 6).

    Layer 1 streams x / W1 in bf16 through a (2, K_tiles) grid:
      axis 0 ("parallel"): two 128-column halves of the 256 outputs -- on v7x
        each TensorCore streams half of the (bf16) W1;
      axis 1 ("arbitrary"): TK-wide K tiles with an f32 VMEM accumulator.
    At the real INPUT_DIM the generation-aware TK (16384 on v7x, 32768 on
    v5e/v6e) makes each bf16 W1 half-tile 4-8 MiB: large double-buffered DMAs
    on the HBM roofline, comfortably inside every generation's VMEM.
    """
    D = x.shape[1]
    w1, b1 = params[0]
    n1 = w1.shape[1]
    assert n1 % 128 == 0, "layer-1 output width must be a multiple of 128"
    nb = n1 // 128                                     # 2 for the 256-wide enc1

    vmem_cap, _ = _tpu_info()
    if tk is None:
        tk = 32768 if vmem_cap >= 100 * 2**20 else 16384
    TK = _pick_tile(D, tk, align=128)
    assert TK == D or (D % TK == 0 and TK % 128 == 0)

    # At real scale W1 would simply be stored in bf16; this cast is a one-time
    # wrapper op for the synthetic f32 params.
    x_bf = x.astype(jnp.bfloat16)
    w1_bf = w1.astype(jnp.bfloat16)

    h1 = pl.pallas_call(
        _enc1_kernel,
        out_shape=jax.ShapeDtypeStruct((1, n1), jnp.float32),
        grid=(nb, D // TK),
        in_specs=[
            pl.BlockSpec((1, TK), lambda n, k: (0, k)),     # x (tiny vs W1)
            # TODO(synk): add pipeline_mode=pl.Buffered(3) on the W1 spec once
            # xprof confirms the stream is DMA-issue bound (few-% win).
            pl.BlockSpec((TK, 128), lambda n, k: (k, n)),   # W1 half-tile (bf16)
            pl.BlockSpec((1, 128), lambda n, k: (0, n)),    # b1 half
        ],
        out_specs=pl.BlockSpec((1, 128), lambda n, k: (0, n)),
        scratch_shapes=[pltpu.VMEM((1, 128), jnp.float32)],
        compiler_params=pltpu.CompilerParams(
            dimension_semantics=("parallel", "arbitrary"),
            vmem_limit_bytes=_vmem_limit_bytes(vmem_cap)),
    )(x_bf, w1_bf, b1[None, :])

    # Remaining 9 tiny layers (M=1 latency filler) in one small call.
    tail_inputs = [h1]
    tail_specs = [pl.BlockSpec((1, n1), lambda i: (0, 0))]
    for w, b in params[1:]:
        tail_inputs += [w, b[None, :]]
        tail_specs += [pl.BlockSpec(w.shape, lambda i: (0, 0)),
                       pl.BlockSpec((1, b.shape[0]), lambda i: (0, 0))]
    n_out = params[-1][0].shape[1]                      # 6

    return pl.pallas_call(
        _mlp_tail_kernel,
        out_shape=jax.ShapeDtypeStruct((1, n_out), jnp.float32),
        grid=(1,),
        in_specs=tail_specs,
        out_specs=pl.BlockSpec((1, n_out), lambda i: (0, 0)),
        compiler_params=pltpu.CompilerParams(dimension_semantics=("arbitrary",)),
    )(*tail_inputs)


# ---------------------------------------------------------------------------
# Kernel 3: affine_grid + grid_sample as a separable tent-weight warp.
# ---------------------------------------------------------------------------
def _warp_kernel(theta_ref, img_ref, o_ref, *, H, W, compute_dtype):
    f32 = jnp.float32
    cdt = compute_dtype
    TO = o_ref.shape[1]                           # output lanes this grid step

    # Flat output indices covered by this step (lane-dense row vector).
    o = lax.broadcasted_iota(jnp.int32, (1, TO), 1) + pl.program_id(0) * TO
    if (W & (W - 1)) == 0:                        # power-of-two W: shift/mask
        oi = jnp.right_shift(o, W.bit_length() - 1)
        oj = jnp.bitwise_and(o, W - 1)
    else:
        oi = o // W
        oj = o - oi * W

    # F.affine_grid(theta, (1,1,H,W), align_corners=False) normalized coords.
    xn = (2.0 * oj.astype(f32) + 1.0) * (1.0 / W) - 1.0      # (1, TO)
    yn = (2.0 * oi.astype(f32) + 1.0) * (1.0 / H) - 1.0      # (1, TO)

    # Hoisted theta broadcasts; grid_sample's unnormalization
    # (align_corners=False) folded into six scalar coefficients.
    th = theta_ref[...]                                       # (1, 6)
    ax = th[:, 0:1] * (0.5 * W)
    bx = th[:, 1:2] * (0.5 * W)
    cx = th[:, 2:3] * (0.5 * W) + 0.5 * (W - 1)
    ay = th[:, 3:4] * (0.5 * H)
    by = th[:, 4:5] * (0.5 * H)
    cy = th[:, 5:6] * (0.5 * H) + 0.5 * (H - 1)
    ix = ax * xn + bx * yn + cx                               # (1, TO) src col (px)
    iy = ay * xn + by * yn + cy                               # (1, TO) src row (px)

    # Separable bilinear tent weights; out-of-bounds sources get weight 0,
    # which is exactly padding_mode='zeros'.  The pixel-coordinate subtraction
    # stays in f32 (bf16 would lose whole pixels at large H/W); the bounded
    # tent values and the stage-2 multiply run in `cdt` (bf16 on v6e/v7x).
    sj = lax.broadcasted_iota(jnp.int32, (W, 1), 0).astype(f32)
    si = lax.broadcasted_iota(jnp.int32, (H, 1), 0).astype(f32)
    wx = jnp.maximum(1.0 - jnp.abs(ix - sj).astype(cdt), 0.0)   # (W, TO) cdt
    wy = jnp.maximum(1.0 - jnp.abs(iy - si).astype(cdt), 0.0)   # (H, TO) cdt

    # Stage 1 (MXU, lane-dense N): T[si,o] = sum_sj img[si,sj] * wx[sj,o].
    # img_ref is already bf16 (cast hoisted to the wrapper).
    tmat = jnp.dot(img_ref[...], wx.astype(jnp.bfloat16),
                   preferred_element_type=cdt)                  # (H, TO)
    # Stage 2: out[o] = sum_si wy[si,o] * T[si,o]  (<=2 nonzero terms/column).
    o_ref[...] = jnp.sum(wy * tmat, axis=0, keepdims=True).astype(f32)


def _apply_warp(theta, moving, *, tile=None):
    H, W = moving.shape
    HW = H * W
    vmem_cap, bf16_valu = _tpu_info()
    if tile is None:
        tile = 512            # fills the 256-wide MXU on v6e/v7x; fewer grid steps
    TO = _pick_tile(HW, tile, align=128)
    assert TO == HW or (HW % TO == 0 and TO % 128 == 0)
    cdt = jnp.bfloat16 if bf16_valu else jnp.float32

    # Cast the moving image once: hoists an HxW VPU cast out of every grid
    # step and halves the resident-image VMEM (relevant on v7x's 64 MiB).
    moving_bf = moving.astype(jnp.bfloat16)
    # TODO(synk): for very large images add a second "arbitrary" row-block
    # axis over (TH, W) image tiles with a (1, TO) f32 stage-2 accumulator so
    # the image need not be fully resident on v7x.

    out_flat = pl.pallas_call(
        functools.partial(_warp_kernel, H=H, W=W, compute_dtype=cdt),
        out_shape=jax.ShapeDtypeStruct((1, HW), jnp.float32),
        grid=(HW // TO,),
        in_specs=[pl.BlockSpec((1, 6), lambda i: (0, 0)),     # theta
                  pl.BlockSpec((H, W), lambda i: (0, 0))],    # moving image (bf16)
        out_specs=pl.BlockSpec((1, TO), lambda i: (0, i)),    # lane-dense output
        compiler_params=pltpu.CompilerParams(
            dimension_semantics=("parallel",),
            vmem_limit_bytes=_vmem_limit_bytes(vmem_cap)),
    )(theta, moving_bf)
    return out_flat.reshape(H, W)


def reg_net_forward(fixed_img, moving_img, params, *, mlp_tk=None, warp_tile=None):
    fixed = fixed_img.astype(jnp.float32)
    moving = moving_img.astype(jnp.float32)
    # np.concatenate((fixed, moving), axis=None) flattens both then concatenates.
    x = jnp.concatenate([fixed.reshape(-1), moving.reshape(-1)])[None, :]  # (1, 2*H*W)
    theta = _compute_theta(x, params, tk=mlp_tk)            # (1, 6)
    return _apply_warp(theta, moving, tile=warp_tile)       # (H, W) == squeeze(deformed)


# ---------------------------------------------------------------------------
# Synthetic params + independent pure-JAX references.
# ---------------------------------------------------------------------------
def init_params(key, d_in):
    """Shapes & init match nn.Linear defaults (U(-1/sqrt(fan_in), 1/sqrt(fan_in))
    for W and b), with W stored transposed as (in, out).  The final bias is
    overridden with a fixed near-identity affine so theta (clamped by the
    spec's final ReLU) is non-degenerate and the warp exercises both interior
    bilinear sampling and the zeros-padding path."""
    dims = [d_in, 256, 128, 64, 32, 16, 32, 64, 128, 256, 6]
    params = []
    for i in range(len(dims) - 1):
        key, kw, kb = jax.random.split(key, 3)
        bound = 1.0 / float(np.sqrt(dims[i]))
        w = jax.random.uniform(kw, (dims[i], dims[i + 1]), jnp.float32, -bound, bound)
        b = jax.random.uniform(kb, (dims[i + 1],), jnp.float32, -bound, bound)
        params.append((w, b))
    w_last, _ = params[-1]
    b_last = jnp.array([1.05, 0.10, 0.15, 0.08, 0.95, 0.20], jnp.float32)
    params[-1] = (w_last, b_last)
    return params


def reference_theta(fixed_img, moving_img, params):
    """Pure-JAX reference with the same layer-1 numerics the kernel streams
    with (bf16-rounded x / W1; bf16 x bf16 products are exact, accumulated in
    f32 -- the review-endorsed trade-off); remaining layers in f32."""
    x = jnp.concatenate([fixed_img.reshape(-1), moving_img.reshape(-1)])[None, :]
    w1, b1 = params[0]
    xb = x.astype(jnp.bfloat16).astype(jnp.float32)
    wb = w1.astype(jnp.bfloat16).astype(jnp.float32)
    h = jax.nn.relu(jnp.dot(xb, wb, precision=lax.Precision.HIGHEST) + b1[None, :])
    for w, b in params[1:]:
        h = jax.nn.relu(jnp.dot(h, w, precision=lax.Precision.HIGHEST) + b[None, :])
    return h                                                  # (1, 6)


def reference_warp(moving_img, theta_vec):
    """Gather-based affine_grid + grid_sample(bilinear, zeros, align_corners=False)
    reference for a given theta."""
    H, W = moving_img.shape
    theta = theta_vec.reshape(-1)
    jj = jnp.arange(W, dtype=jnp.float32)
    ii = jnp.arange(H, dtype=jnp.float32)
    xn = (2.0 * jj + 1.0) / W - 1.0
    yn = (2.0 * ii + 1.0) / H - 1.0
    XN, YN = jnp.meshgrid(xn, yn)
    gx = theta[0] * XN + theta[1] * YN + theta[2]
    gy = theta[3] * XN + theta[4] * YN + theta[5]
    ix = ((gx + 1.0) * W - 1.0) * 0.5
    iy = ((gy + 1.0) * H - 1.0) * 0.5
    x0 = jnp.floor(ix); x1 = x0 + 1.0
    y0 = jnp.floor(iy); y1 = y0 + 1.0
    wx1 = ix - x0; wx0 = 1.0 - wx1
    wy1 = iy - y0; wy0 = 1.0 - wy1

    def sample(yy, xx):
        valid = (xx >= 0) & (xx <= W - 1) & (yy >= 0) & (yy <= H - 1)
        xc = jnp.clip(xx, 0, W - 1).astype(jnp.int32)
        yc = jnp.clip(yy, 0, H - 1).astype(jnp.int32)
        return jnp.where(valid, moving_img[yc, xc], 0.0)

    return (sample(y0, x0) * wy0 * wx0 + sample(y0, x1) * wy0 * wx1 +
            sample(y1, x0) * wy1 * wx0 + sample(y1, x1) * wy1 * wx1)


if __name__ == "__main__":
    H = W = 32
    D = 2 * H * W   # small stand-in for INPUT_DIM = 7,864,320

    key = jax.random.PRNGKey(0)
    key, kf = jax.random.split(key)
    fixed_img = jax.random.normal(kf, (H, W), jnp.float32)
    ii = jnp.arange(H, dtype=jnp.float32)[:, None]
    jj = jnp.arange(W, dtype=jnp.float32)[None, :]
    # smooth synthetic moving image (keeps bilinear sampling well-conditioned)
    moving_img = (0.5 * (ii / H + jj / W)
                  + 0.1 * jnp.sin(2.0 * jnp.pi * ii / H)
                  * jnp.cos(2.0 * jnp.pi * jj / W)).astype(jnp.float32)

    params = init_params(key, D)

    # End-to-end forward with generation-aware defaults.
    out = jax.block_until_ready(reg_net_forward(fixed_img, moving_img, params))
    assert out.shape == (H, W) and out.dtype == jnp.float32

    # MLP / theta path checks.
    x = jnp.concatenate([fixed_img.reshape(-1), moving_img.reshape(-1)])[None, :]
    theta_ref = reference_theta(fixed_img, moving_img, params)
    theta_default = jax.block_until_ready(_compute_theta(x, params))
    theta_stream = jax.block_until_ready(_compute_theta(x, params, tk=256))  # 8 K-steps
    np.testing.assert_allclose(np.asarray(theta_default), np.asarray(theta_ref),
                               atol=2e-2, rtol=2e-2)
    np.testing.assert_allclose(np.asarray(theta_stream), np.asarray(theta_ref),
                               atol=2e-2, rtol=2e-2)
    np.testing.assert_allclose(np.asarray(theta_stream), np.asarray(theta_default),
                               atol=1e-3, rtol=1e-2)

    # Warp check against a gather-based grid_sample reference driven by the
    # same theta the kernel produced (isolates the warp kernel's numerics).
    ref_out = reference_warp(moving_img, theta_default.reshape(-1))
    np.testing.assert_allclose(np.asarray(out), np.asarray(ref_out),
                               atol=5e-2, rtol=5e-2)

    print("KERNEL_OK")
</pallas_src>

<mosaic_0001>
module attributes {stable_mosaic.version = 11 : i64} {
  func.func @_enc1_kernel(%arg0: i32, %arg1: i32, %arg2: memref<1x2048xbf16, #tpu.memory_space<vmem>>, %arg3: memref<2048x128xbf16, #tpu.memory_space<vmem>>, %arg4: memref<1x128xf32, #tpu.memory_space<vmem>>, %arg5: memref<1x128xf32, #tpu.memory_space<vmem>>, %arg6: memref<1x128xf32, #tpu.memory_space<vmem>>) attributes {dimension_semantics = [#tpu.dimension_semantics<parallel>, #tpu.dimension_semantics<arbitrary>], iteration_bounds = array<i64: 2, 1>, scalar_prefetch = 0 : i64, scratch_operands = 1 : i64, tpu.core_type = #tpu.core_type<tc>, window_params = [{transform_indices = @transform_0, window_bounds = array<i64: 1, 2048>}, {transform_indices = @transform_1, window_bounds = array<i64: 2048, 128>}, {transform_indices = @transform_2, window_bounds = array<i64: 1, 128>}, {transform_indices = @transform_3, window_bounds = array<i64: 1, 128>}]} {
    %c0_i32 = arith.constant 0 : i32
    %0 = arith.cmpi eq, %arg1, %c0_i32 : i32
    %1 = arith.extui %0 : i1 to i32
    %c0_i32_0 = arith.constant 0 : i32
    %2 = arith.cmpi ne, %1, %c0_i32_0 : i32
    scf.if %2 {
      %cst_10 = arith.constant 0.000000e+00 : f32
      %12 = vector.broadcast %cst_10 : f32 to vector<1x128xf32>
      %c0_11 = arith.constant 0 : index
      %c0_12 = arith.constant 0 : index
      %13 = vector.load %arg6[%c0_11, %c0_12] : memref<1x128xf32, #tpu.memory_space<vmem>>, vector<1x128xf32>
      tpu.vector_store %arg6[%c0_11, %c0_12], %12 {strides = array<i32>} : memref<1x128xf32, #tpu.memory_space<vmem>>, vector<1x128xf32>,
    } else {
    }
    %c0 = arith.constant 0 : index
    %c0_1 = arith.constant 0 : index
    %3 = vector.load %arg6[%c0, %c0_1] : memref<1x128xf32, #tpu.memory_space<vmem>>, vector<1x128xf32>
    %c0_2 = arith.constant 0 : index
    %c0_3 = arith.constant 0 : index
    %4 = vector.load %arg2[%c0_2, %c0_3] : memref<1x2048xbf16, #tpu.memory_space<vmem>>, vector<1x2048xbf16>
    %c0_4 = arith.constant 0 : index
    %c0_5 = arith.constant 0 : index
    %5 = vector.load %arg3[%c0_4, %c0_5] : memref<2048x128xbf16, #tpu.memory_space<vmem>>, vector<2048x128xbf16>
    %cst = arith.constant dense<0.000000e+00> : vector<1x128xf32>
    %6 = tpu.matmul %4, %5, %cst {dimension_numbers = #tpu.dot_dimension_numbers<[1], [0], [0], [1], [0, 0, 1, 1], [], []>} : vector<1x2048xbf16>, vector<2048x128xbf16>, vector<1x128xf32> -> vector<1x128xf32>
    %7 = arith.addf %3, %6 : vector<1x128xf32>
    %c0_6 = arith.constant 0 : index
    %c0_7 = arith.constant 0 : index
    %8 = vector.load %arg6[%c0_6, %c0_7] : memref<1x128xf32, #tpu.memory_space<vmem>>, vector<1x128xf32>
    tpu.vector_store %arg6[%c0_6, %c0_7], %7 {strides = array<i32>} : memref<1x128xf32, #tpu.memory_space<vmem>>, vector<1x128xf32>,
    %c0_i32_8 = arith.constant 0 : i32
    %9 = arith.cmpi eq, %arg1, %c0_i32_8 : i32
    %10 = arith.extui %9 : i1 to i32
    %c0_i32_9 = arith.constant 0 : i32
    %11 = arith.cmpi ne, %10, %c0_i32_9 : i32
    scf.if %11 {
      %c0_10 = arith.constant 0 : index
      %c0_11 = arith.constant 0 : index
      %12 = vector.load %arg6[%c0_10, %c0_11] : memref<1x128xf32, #tpu.memory_space<vmem>>, vector<1x128xf32>
      %c0_12 = arith.constant 0 : index
      %c0_13 = arith.constant 0 : index
      %13 = vector.load %arg4[%c0_12, %c0_13] : memref<1x128xf32, #tpu.memory_space<vmem>>, vector<1x128xf32>
      %14 = arith.addf %12, %13 : vector<1x128xf32>
      %cst_14 = arith.constant 0.000000e+00 : f32
      %15 = vector.broadcast %cst_14 : f32 to vector<1x128xf32>
      %16 = arith.maximumf %14, %15 : vector<1x128xf32>
      %c0_15 = arith.constant 0 : index
      %c0_16 = arith.constant 0 : index
      %17 = vector.load %arg5[%c0_15, %c0_16] : memref<1x128xf32, #tpu.memory_space<vmem>>, vector<1x128xf32>
      tpu.vector_store %arg5[%c0_15, %c0_16], %16 {strides = array<i32>} : memref<1x128xf32, #tpu.memory_space<vmem>>, vector<1x128xf32>,
    } else {
    }
    return
  }
  func.func @transform_0(%arg0: i32, %arg1: i32) -> (i32, i32) {
    %c0_i32 = arith.constant 0 : i32
    %c0_i32_0 = arith.constant 0 : i32
    return %c0_i32, %arg1 : i32, i32
  }
  func.func @transform_1(%arg0: i32, %arg1: i32) -> (i32, i32) {
    %c0_i32 = arith.constant 0 : i32
    return %arg1, %arg0 : i32, i32
  }
  func.func @transform_2(%arg0: i32, %arg1: i32) -> (i32, i32) {
    %c0_i32 = arith.constant 0 : i32
    %c0_i32_0 = arith.constant 0 : i32
    return %c0_i32, %arg0 : i32, i32
  }
  func.func @transform_3(%arg0: i32, %arg1: i32) -> (i32, i32) {
    %c0_i32 = arith.constant 0 : i32
    %c0_i32_0 = arith.constant 0 : i32
    return %c0_i32, %arg0 : i32, i32
  }
}

</mosaic_0001>

<bundles_post_ra>
// kernel: tpu_custom_call.1
= control target key start
LH: loop header
LB: loop body
LE: loop exit
PB: predicated region body
PF: predicated region fallthrough
CT: control target
= control target key end

     0   :  { %s2848_s0 = inlined_call_operand.hbm [shape: bf16[1,2048], index: 0, kind: input, shape index: {}]   ;;  %s2849_s1 = inlined_call_operand.hbm [shape: bf16[2048,256], index: 1, kind: input, shape index: {}]   ;;  %s2850_s2 = inlined_call_operand.vmem [shape: f32[1,256], index: 2, kind: input, shape index: {}]   ;;  %s2851_s3 = inlined_call_operand.hbm [shape: f32[1,256], index: 3, kind: output, shape index: {}]  }
   0x1   :  { %2854 = sst [smem:[#allocation12_spill]] %s2848_s0 }
   0x2   :  { %8 = vsyncpa [#allocation4], 0 }
   0x3   :  { %9 = vsyncpa [#allocation7], 0 }
   0x4   :  { %11 = vsyncpa [#allocation7 + $0x1], 0 }
   0x5   :  { %12 = vsyncpa [#allocation5], 0 }
   0x6   :  { %14 = vsyncpa [#allocation5 + $0x1], 0  ;;  %s2525_s12 = smov 0   ;;  %s2527_s13 = smov 0  }
   0x7   :  { %s2529_s14 = smov 0   ;;  %s2531_s15 = smov 0  }
   0x8   :  { %s2533_s16 = smov 0   ;;  %s2535_s17 = smov 0  }
   0x9 LB: > { %s1832_s18 = sadd.s32 4294967295, %s2495_s17   ;;  %s1833_s19 = sadd.s32 4294967294, %s2495_s17   ;;  %s2495_s17 = sphi %s2535_s17, %s20_s17   ;;  %s2491_s16 = sphi %s2533_s16, %s2872_s16   ;;  %s2487_s15 = sphi %s2531_s15, %s2871_s15   ;;  %s2483_s14 = sphi %s2529_s14, %s2870_s14   ;;  %s2479_s13 = sphi %s2527_s13, %s2869_s13   ;;  %s2475_s12 = sphi %s2525_s12, %s2868_s12  }
   0xa   : > { %s67_s20 = sadd.s32 1, %s2483_s14  ;;  %p74_p0 = scmp.ne.s32.totalorder %s2483_s14, %s2479_s13 }
   0xb   : > { %p75_p1 = scmp.eq.s32.totalorder %s2495_s17, 0  ;;  %p80_p2 = scmp.ne.s32.totalorder %s2479_s13, %s2475_s12 }
   0xc   : > { %p2563_p3 = scmp.eq.s32.totalorder %s1832_s18, 0  ;;  %p130_p4 = scmp.eq.s32.totalorder %s1832_s18, 1 }
   0xd   : > { %p2567_p5 = por %p75_p1, %p74_p0  ;;  %p136_p6 = scmp.eq.s32.totalorder %s1833_s19, 1 }
   0xe   : > { %p2573_p7 = por %p2563_p3, %p80_p2  ;;  %p2577_p8 = por %p130_p4, %p74_p0 }
   0xf   : > { %p2581_p9 = por %p136_p6, %p80_p2  ;;  %p1834_p10 = scmp.ge.s32.totalorder %s2495_s17, 1 }
  0x10   : > { %s2857_s23 = scalar_select %p2573_p7, 1, 0 }
  0x11   : > { %s2858_s24 = scalar_select %p2577_p8, 1, 0 }
  0x12   : > { %s2859_s25 = scalar_select %p2581_p9, 1, 0 }
  0x13   : > { %p143_p11 = scmp.lt.s32.totalorder %s2495_s17, 3  ;;  %s2497_s27 = smov [#allocation3]  }
  0x14   : > { %s159_s28 = sshll.u32 %s2497_s27, 4  ;;  %p2170_p1 = scmp.lt.s32.totalorder %s2495_s17, 2  ;;  %s160_s28 = int_to_ptr.vmem [resolvable:$true] %s159_s28 }
  0x15   : > { %p2588_p13 = pnand %p1834_p10, %p143_p11  ;;  %s32_s4 = sadd.s32 1, %s2491_s16 }
  0x16   : > { %p2597_p4 = pnand %p2170_p1, %p2567_p5  ;;  %p34_p6 = scmp.ge.s32.totalorder %s32_s4, 2 }
  0x17   : > { %p2157_p0 = pneg %p2588_p13  ;;  %s170_s5 = sand.u32 1, %s2483_s14  }
  0x18   : > { %s2368_s6 = scalar_lea.vmem %s160_s28, 256  ;;  %p2376_p8 = scmp.lt.s32.totalorder %s160_s28, %s160_s28 }
  0x19   : > { %p2603_p2 = pnand %p2157_p0, %p2563_p3  ;;  %p2369_p11 = scmp.ne.s32.totalorder %s160_s28, %s2368_s6 }
  0x1a   : > { %p2377_p5 = scmp.lt.s32.totalorder %s2368_s6, %s2368_s6 }
  0x1b   : > { %p2359_p10 = pneg %p2603_p2 }
  0x1c   : > { %p2378_p1 = por %p2377_p5, %p2376_p8 }
  0x1d   : > { %p2371_p12 = pnand %p2369_p11, %p2359_p10 }
  0x1f   : > { %p2372_p9 = pneg %p2371_p12 }
  0x21   : > { %p2379_p7 = pnand %p2378_p1, %p2372_p9 }
  0x23   : > { %2382 = shalt.err (!%p2379_p7)
}
  0x24   : > { %s2863_s0 = sld [smem:[#allocation12_spill]]  ;;  %s2874_s4 = smov (%p34_p6, %s32_s4), 0 }
  0x25   : > { %s1837_s9 = sshll.u32 %s170_s5, 10  ;;  %s63_s10 = ssub.s32 %s2491_s16, %s2874_s4 }
  0x26   : > { %p65_p12 = scmp.eq.s32.totalorder %s63_s10, 0  ;;  %s1838_s11 = sshll.u32 %s2491_s16, 6 }
  0x27   : > { %s182_s22 = scalar_lea.hbm %s2849_s1, %s1838_s11  ;;  %s174_s27 = scalar_lea.vmem [#allocation6], %s1837_s9 }
  0x28   : > { %s183_s30 = sshll.u32 %s174_s27, 4  ;;  %s171_s7 = scalar_lea.sflag [#allocation7], %s170_s5  ;;  %s184_s30 = int_to_ptr.vmem [resolvable:$true] %s183_s30 }
  0x29   : > { %s2627_s6 = scalar_select %p65_p12, %s2483_s14, %s67_s20  }
  0x2a   : > { %2160 = dma.hbm_to_vmem [thread:$0]  (!%p2603_p2), %s2863_s0, 256, %s160_s28, [#allocation4]  }
  0x2b   : > { %p2385_p7 = pneg %p2597_p4  ;;  %s2396_s28 = scalar_lea.vmem %s184_s30, 16384 }
  0x2c   : > { %p2397_p8 = scmp.ne.s32.totalorder %s184_s30, %s2396_s28  ;;  %s2498_s8 = smov [#allocation6]  }
  0x2d   : > { %s2401_s10 = sshll.u32 %s2498_s8, 4  ;;  %s2402_s10 = int_to_ptr.vmem [resolvable:$false] %s2401_s10 }
  0x2e   : > { %p2399_p9 = pnand %p2397_p8, %p2385_p7  ;;  %s2403_s0 = scalar_lea.vmem %s2402_s10, 32768 }
  0x2f   : > { %p2404_p2 = scmp.lt.s32.totalorder %s184_s30, %s2402_s10  ;;  %p2405_p6 = scmp.lt.s32.totalorder %s2403_s0, %s2396_s28 }
  0x30   : > { %p2400_p0 = pneg %p2399_p9 }
  0x31   : > { %p2406_p10 = por %p2405_p6, %p2404_p2 }
  0x33   : > { %p2407_p11 = pnand %p2406_p10, %p2400_p0 }
  0x35   : > { %2410 = shalt.err (!%p2407_p11)
}
  0x36   : > { %s2499_s9 = smov 128   ;;  %s2500_s20 = smov 64  }
  0x37   : > { %s2501_s11 = smov 4   ;;  %201 = sbr.rel (%p2588_p13) target bundleno = 423 (0x1a7), region = 32 }
  0x38   : > { %2164 = dma.hbm_to_vmem [thread:$0]  (!%p2597_p4), %s182_s22, 16384, %s184_s30, %s171_s7, %s2499_s9, %s2500_s20, %s2501_s11  }
  0x3c   : > { %2462 = dma.done.wait (%p2563_p3), [#allocation4], 256  }
  0x3d   : > { %2464 = vsyncadd (%p2563_p3), [#allocation4], 4294967040  ;;  %s2640_s0 = sand.u32 1, %s2479_s13   ;;  %p2864_p4 = scmp.ne.s32.totalorder %s2857_s23, 0 }
  0x3e   : > { %s1841_s5 = sshll.u32 %s2640_s0, 10  ;;  %s208_s18 = scalar_lea.sflag [#allocation7], %s2640_s0 }
  0x3f   : > { %s2644_s19 = scalar_lea.vmem [#allocation6], %s1841_s5 }
  0x40   : > { %2466 = dma.done.wait (%p2864_p4), %s208_s18, 16384  }
  0x41   : > { %2468 = vsyncadd (%p2864_p4), %s208_s18, 4294950912  ;;  %v2227_v0 = vld [vmem:[%s2644_s19 + $0x78] sm:$0xff]   ;;  %v2231_v4 = vld [vmem:[%s2644_s19 + $0x70] sm:$0xff]   ;;  %v2502_v22 = vmov 1966171168   ;;  %v512_v24 = vlaneseq  ;;  %p238_p3 = scmp.lt.s32.totalorder %s2487_s15, 1 }
  0x42   : > { %v2228_v1 = vld [vmem:[%s2644_s19 + $0xf8] sm:$0xff]   ;;  %1973 = vmatprep.subr.bf16.mxu0 %v2227_v0  ;;  %v2232_v5 = vld [vmem:[%s2644_s19 + $0xf0] sm:$0xff]   ;;  %v2235_v8 = vld [vmem:[%s2644_s19 + $0x68] sm:$0xff]   ;;  %v510_v23 = vunpack.c.l.s4 %v2502_v22  ;;  %s1970_s22 = sshll.u32 %s2487_s15, 4  ;;  %s235_s27 = scalar_lea.vmem [#allocation8], %s2640_s0 }
  0x43   : > { %v2229_v2 = vld [vmem:[%s2644_s19 + $0x38] sm:$0xff]   ;;  %1995 = vmatprep.subr.bf16.mxu1 %v2228_v1  ;;  %v2233_v6 = vld [vmem:[%s2644_s19 + $0x30] sm:$0xff]   ;;  %v2236_v9 = vld [vmem:[%s2644_s19 + $0xe8] sm:$0xff]   ;;  %v513_v30 = vshrl.u32 %v512_v24, 7  ;;  %s239_s21 = scalar_select %p238_p3, %s2487_s15, 1 }
  0x44   : > { %v2230_v3 = vld [vmem:[%s2644_s19 + $0xb8] sm:$0xff]   ;;  %1974 = vmatpush3.bf16.msra.mxu0 %v2229_v2  ;;  %v2234_v7 = vld [vmem:[%s2644_s19 + $0xb0] sm:$0xff]   ;;  %v2237_v10 = vld [vmem:[%s2644_s19 + $0x28] sm:$0xff]   ;;  %v511_v29 = vunpack.c.0.s8 %v510_v23  ;;  %s1733_s30 = sshll.u32 %s235_s27, 4  ;;  %s1731_s8 = scalar_lea.hbm %s2851_s3, %s1970_s22  ;;  %s1734_s30 = int_to_ptr.vmem [resolvable:$true] %s1733_s30 }
  0x45   : > { %1996 = vmatpush3.bf16.msra.mxu1 %v2230_v3  ;;  %1975 = vmatprep.subr.bf16.mxu0 %v2231_v4  ;;  %v2238_v11 = vld [vmem:[%s2644_s19 + $0xa8] sm:$0xff]   ;;  %v2239_v12 = vld [vmem:[%s2644_s19 + $0x60] sm:$0xff]   ;;  %v2243_v16 = vld [vmem:[%s2644_s19 + $0x58] sm:$0xff]   ;;  %s240_s29 = scalar_lea.vmem %s2850_s2, %s239_s21  ;;  %s1721_s10 = scalar_lea.sflag [#allocation5], %s2640_s0 }
  0x46   : > { %1997 = vmatprep.subr.bf16.mxu1 %v2232_v5  ;;  %v2240_v13 = vld [vmem:[%s2644_s19 + $0xe0] sm:$0xff]   ;;  %v2244_v17 = vld [vmem:[%s2644_s19 + $0xd8] sm:$0xff]   ;;  %v2247_v20 = vld [vmem:[%s2644_s19 + $0x50] sm:$0xff]   ;;  %v2680_v35 = vsub.s32 %v511_v29, %v513_v30  ;;  %s2411_s9 = scalar_lea.vmem %s1734_s30, 16  ;;  %p2865_p5 = scmp.ne.s32.totalorder %s2858_s24, 0 }
  0x47   : > { %v2241_v14 = vld [vmem:[%s2644_s19 + $0x20] sm:$0xff]   ;;  %v2245_v18 = vld [vmem:[%s2644_s19 + $0x18] sm:$0xff]   ;;  %v2248_v21 = vld [vmem:[%s2644_s19 + $0xd0] sm:$0xff]   ;;  %p2412_p13 = scmp.ne.s32.totalorder %s1734_s30, %s2411_s9  ;;  %s2504_s20 = smov [#allocation8]  }
  0x48   : > { %1976 = vmatpush3.bf16.msra.mxu0 %v2233_v6  ;;  %v2242_v15 = vld [vmem:[%s2644_s19 + $0xa0] sm:$0xff]   ;;  %v2246_v19 = vld [vmem:[%s2644_s19 + $0x98] sm:$0xff]   ;;  %v2249_v25 = vld [vmem:[%s2644_s19 + $0x10] sm:$0xff]   ;;  %s2415_s11 = sshll.u32 %s2504_s20, 4  ;;  %s2416_s11 = int_to_ptr.vmem [resolvable:$false] %s2415_s11 }
  0x49   : > { %1998 = vmatpush3.bf16.msra.mxu1 %v2234_v7  ;;  %1977 = vmatprep.subr.bf16.mxu0 %v2235_v8  ;;  %v2250_v26 = vld [vmem:[%s2644_s19 + $0x90] sm:$0xff]   ;;  %v2251_v27 = vld [vmem:[%s2644_s19 + $0x48] sm:$0xff]   ;;  %v2255_v33 = vld [vmem:[%s2644_s19 + $0x40] sm:$0xff]   ;;  %p2413_p1 = pnand %p2412_p13, %p2865_p5  ;;  %s2417_s15 = scalar_lea.vmem %s2416_s11, 32 }
  0x4a   : > { %1999 = vmatprep.subr.bf16.mxu1 %v2236_v9  ;;  %v2252_v28 = vld [vmem:[%s2644_s19 + $0xc8] sm:$0xff]   ;;  %v2256_v34 = vld [vmem:[%s2644_s19 + $0xc0] sm:$0xff]   ;;  %v248_v38 = vld [vmem:[#allocation3] sm:$0xff]  ;;  %p2418_p7 = scmp.lt.s32.totalorder %s1734_s30, %s2416_s11  ;;  %p2419_p8 = scmp.lt.s32.totalorder %s2417_s15, %s2411_s9 }
  0x4b   : > { %v2253_v31 = vld [vmem:[%s2644_s19 + $0x8] sm:$0xff]   ;;  %v2257_v36 = vld [vmem:[%s2644_s19] sm:$0xff]   ;;  %v508_v39 = vcombine.high %v248_v38, %v248_v38  ;;  %v515_v40 = vrot.slane %v248_v38, %v2680_v35  ;;  %v2260_v41 = vld [vmem:[%s2644_s19 + $0x178] sm:$0xff]   ;;  %p2414_p12 = pneg %p2413_p1 }
  0x4c   : > { %1978 = vmatpush3.bf16.msra.mxu0 %v2237_v10  ;;  %v2254_v32 = vld [vmem:[%s2644_s19 + $0x88] sm:$0xff]   ;;  %v2258_v37 = vld [vmem:[%s2644_s19 + $0x80] sm:$0xff]   ;;  %v2261_v42 = vld [vmem:[%s2644_s19 + $0x1f8] sm:$0xff]   ;;  %p2420_p9 = por %p2419_p8, %p2418_p7 }
  0x4d   : > { %2000 = vmatpush3.bf16.msra.mxu1 %v2238_v11  ;;  %1979 = vmatprep.subr.bf16.mxu0 %v2239_v12  ;;  %v523_v43 = vcombine.high %v515_v40, %v515_v40  ;;  %v531_v44 = vrot.slane %v515_v40, %v2680_v35  ;;  %v2689_v45 = vrot.slane %v508_v39, %v2680_v35  ;;  %v2262_v47 = vld [vmem:[%s2644_s19 + $0x138] sm:$0xff]   ;;  %v2264_v50 = vld [vmem:[%s2644_s19 + $0x170] sm:$0xff]   ;;  %v2268_v57 = vld [vmem:[%s2644_s19 + $0x168] sm:$0xff]  }
  0x4e   : > { %2001 = vmatprep.subr.bf16.mxu1 %v2240_v13  ;;  %v2263_v52 = vld [vmem:[%s2644_s19 + $0x1b8] sm:$0xff]   ;;  %v2265_v54 = vld [vmem:[%s2644_s19 + $0x1f0] sm:$0xff]   ;;  %v2269_v59 = vld [vmem:[%s2644_s19 + $0x1e8] sm:$0xff]   ;;  %p2421_p0 = pnand %p2420_p9, %p2414_p12 }
  0x4f   : > { %v545_v46 = vrot.slane %v523_v43, %v2680_v35  ;;  %v524_v48 = vcombine.high %v2689_v45, %v2689_v45  ;;  %v553_v49 = vcombine.high %v531_v44, %v531_v44  ;;  %v2266_v55 = vld [vmem:[%s2644_s19 + $0x130] sm:$0xff]   ;;  %v2270_v60 = vld [vmem:[%s2644_s19 + $0x128] sm:$0xff]   ;;  %v2272_v61 = vld [vmem:[%s2644_s19 + $0x160] sm:$0xff]  }
  0x50   : > { %1980 = vmatpush3.bf16.msra.mxu0 %v2241_v14  ;;  %v2267_v58 = vld [vmem:[%s2644_s19 + $0x1b0] sm:$0xff]   ;;  %v2271_v62 = vld [vmem:[%s2644_s19 + $0x1a8] sm:$0xff]   ;;  %v2273_v63 = vld [vmem:[%s2644_s19 + $0x1e0] sm:$0xff]  }
  0x51   : > { %2002 = vmatpush3.bf16.msra.mxu1 %v2242_v15  ;;  %1981 = vmatprep.subr.bf16.mxu0 %v2243_v16  ;;  %v555_v51 = vcombine.high %v545_v46, %v545_v46  ;;  %v552_v53 = vrot.slane %v524_v48, %v2680_v35  ;;  %v2274_v0 = vld [vmem:[%s2644_s19 + $0x120] sm:$0xff]   ;;  %v2276_v1 = vld [vmem:[%s2644_s19 + $0x158] sm:$0xff]   ;;  %v2280_v5 = vld [vmem:[%s2644_s19 + $0x150] sm:$0xff]  }
  0x52   : > { %2003 = vmatprep.subr.bf16.mxu1 %v2244_v17  ;;  %1422 = vmatprep.mubr.bf16.mxu0 %v545_v46  ;;  %v2275_v2 = vld [vmem:[%s2644_s19 + $0x1a0] sm:$0xff]   ;;  %v2277_v3 = vld [vmem:[%s2644_s19 + $0x1d8] sm:$0xff]   ;;  %v2281_v7 = vld [vmem:[%s2644_s19 + $0x1d0] sm:$0xff]   ;;  %v538_v17 = vrot.slane %v2689_v45, %v2680_v35 }
  0x53   : > { %1462 = vmatprep.mubr.bf16.mxu1 %v555_v51  ;;  %v556_v56 = vcombine.high %v552_v53, %v552_v53  ;;  %v2278_v4 = vld [vmem:[%s2644_s19 + $0x118] sm:$0xff]   ;;  %v2282_v8 = vld [vmem:[%s2644_s19 + $0x110] sm:$0xff]   ;;  %v2284_v9 = vld [vmem:[%s2644_s19 + $0x148] sm:$0xff]  }
  0x54   : > { %1982 = vmatpush3.bf16.msra.mxu0 %v2245_v18  ;;  %v2279_v6 = vld [vmem:[%s2644_s19 + $0x198] sm:$0xff]   ;;  %v2283_v10 = vld [vmem:[%s2644_s19 + $0x190] sm:$0xff]   ;;  %v2285_v11 = vld [vmem:[%s2644_s19 + $0x1c8] sm:$0xff]   ;;  %v554_v22 = vcombine.high %v538_v17, %v538_v17 }
  0x55   : > { %2004 = vmatpush3.bf16.msra.mxu1 %v2246_v19  ;;  %1983 = vmatprep.subr.bf16.mxu0 %v2247_v20  ;;  %v2286_v12 = vld [vmem:[%s2644_s19 + $0x108] sm:$0xff]   ;;  %v2288_v13 = vld [vmem:[%s2644_s19 + $0x140] sm:$0xff]   ;;  %v2292_v18 = vld [vmem:[%s2644_s19 + $0x278] sm:$0xff]  }
  0x56   : > { %2005 = vmatprep.subr.bf16.mxu1 %v2248_v21  ;;  %v2287_v14 = vld [vmem:[%s2644_s19 + $0x188] sm:$0xff]   ;;  %v2289_v15 = vld [vmem:[%s2644_s19 + $0x1c0] sm:$0xff]   ;;  %v2293_v20 = vld [vmem:[%s2644_s19 + $0x2f8] sm:$0xff]  }
  0x57   : > { %v2290_v16 = vld [vmem:[%s2644_s19 + $0x100] sm:$0xff]   ;;  %v2294_v21 = vld [vmem:[%s2644_s19 + $0x238] sm:$0xff]   ;;  %v2296_v23 = vld [vmem:[%s2644_s19 + $0x270] sm:$0xff]  }
  0x58   : > { %1984 = vmatpush3.bf16.msra.mxu0 %v2249_v25  ;;  %v2291_v19 = vld [vmem:[%s2644_s19 + $0x180] sm:$0xff]   ;;  %v2295_v24 = vld [vmem:[%s2644_s19 + $0x2b8] sm:$0xff]   ;;  %v2297_v25 = vld [vmem:[%s2644_s19 + $0x2f0] sm:$0xff]  }
  0x59   : > { %2006 = vmatpush3.bf16.msra.mxu1 %v2250_v26  ;;  %1985 = vmatprep.subr.bf16.mxu0 %v2251_v27  ;;  %v2298_v26 = vld [vmem:[%s2644_s19 + $0x230] sm:$0xff]   ;;  %v2300_v27 = vld [vmem:[%s2644_s19 + $0x268] sm:$0xff]   ;;  %v2309_v38 = vld [vmem:[%s2644_s19 + $0x2d8] sm:$0xff]  }
  0x5a   : > { %2007 = vmatprep.subr.bf16.mxu1 %v2252_v28  ;;  %v2299_v28 = vld [vmem:[%s2644_s19 + $0x2b0] sm:$0xff]   ;;  %v2301_v29 = vld [vmem:[%s2644_s19 + $0x2e8] sm:$0xff]   ;;  %v2310_v39 = vld [vmem:[%s2644_s19 + $0x218] sm:$0xff]  }
  0x5b   : > { %v2302_v30 = vld [vmem:[%s2644_s19 + $0x228] sm:$0xff]   ;;  %v2312_v40 = vld [vmem:[%s2644_s19 + $0x250] sm:$0xff]   ;;  %v2320_v48 = vld [vmem:[%s2644_s19 + $0x240] sm:$0xff]  }
  0x5c   : > { %1986 = vmatpush3.bf16.msra.mxu0 %v2253_v31  ;;  %v2304_v31 = vld [vmem:[%s2644_s19 + $0x260] sm:$0xff]   ;;  %v2314_v43 = vld [vmem:[%s2644_s19 + $0x210] sm:$0xff]   ;;  %v2317_v46 = vld [vmem:[%s2644_s19 + $0x2c8] sm:$0xff]  }
  0x5d   : > { %2008 = vmatpush3.bf16.msra.mxu1 %v2254_v32  ;;  %1987 = vmatprep.subr.bf16.mxu0 %v2255_v33  ;;  %v2303_v32 = vld [vmem:[%s2644_s19 + $0x2a8] sm:$0xff]   ;;  %v2305_v33 = vld [vmem:[%s2644_s19 + $0x2e0] sm:$0xff]   ;;  %v2315_v45 = vld [vmem:[%s2644_s19 + $0x290] sm:$0xff]  }
  0x5e   : > { %2009 = vmatprep.subr.bf16.mxu1 %v2256_v34  ;;  %v2306_v34 = vld [vmem:[%s2644_s19 + $0x220] sm:$0xff]   ;;  %v249_v51 = vld [vmem:[#allocation3 + $0x8] sm:$0xff] }
  0x60   : > { %1988 = vmatpush3.bf16.msra.mxu0 %v2257_v36  ;;  %v2308_v36 = vld [vmem:[%s2644_s19 + $0x258] sm:$0xff]  }
  0x61   : > { %2010 = vmatpush3.bf16.msra.mxu1 %v2258_v37  ;;  %2017 = vmatprep.subr.bf16.mxu0 %v2260_v41  ;;  %v2307_v37 = vld [vmem:[%s2644_s19 + $0x2a0] sm:$0xff]   ;;  %v2311_v41 = vld [vmem:[%s2644_s19 + $0x298] sm:$0xff]  }
  0x62   : > { %2039 = vmatprep.subr.bf16.mxu1 %v2261_v42  ;;  %v2313_v42 = vld [vmem:[%s2644_s19 + $0x2d0] sm:$0xff]  }
  0x63   : > { %1423 = vmatmul.mubr.bf16.vlgmr.msra.gmra.mxu0 %v531_v44  ;;  %v2316_v44 = vld [vmem:[%s2644_s19 + $0x248] sm:$0xff]  }
  0x64   : > { %2018 = vmatpush3.bf16.msra.mxu0 %v2262_v47  ;;  %1463 = vmatmul.mubr.bf16.vlgmr.msra.gmra.mxu1 %v553_v49  ;;  %v2318_v47 = vld [vmem:[%s2644_s19 + $0x208] sm:$0xff]  }
  0x65   : > { %2019 = vmatprep.subr.bf16.mxu0 %v2264_v50  ;;  %2040 = vmatpush3.bf16.msra.mxu1 %v2263_v52  ;;  %v2319_v49 = vld [vmem:[%s2644_s19 + $0x288] sm:$0xff]   ;;  %v2321_v50 = vld [vmem:[%s2644_s19 + $0x2c0] sm:$0xff]  }
  0x66   : > { %1502 = vmatprep.mubr.bf16.mxu0 %v552_v53  ;;  %2041 = vmatprep.subr.bf16.mxu1 %v2265_v54  ;;  %v2322_v52 = vld [vmem:[%s2644_s19 + $0x200] sm:$0xff]   ;;  %v564_v53 = vrot.slane %v249_v51, %v2680_v35  ;;  %v557_v54 = vcombine.high %v249_v51, %v249_v51 }
  0x67   : > { %1542 = vmatprep.mubr.bf16.mxu1 %v556_v56  ;;  %v2323_v56 = vld [vmem:[%s2644_s19 + $0x280] sm:$0xff]  }
  0x68   : > { %2020 = vmatpush3.bf16.msra.mxu0 %v2266_v55  ;;  %v2324_v55 = vld [vmem:[%s2644_s19 + $0x378] sm:$0xff]  }
  0x69   : > { %2021 = vmatprep.subr.bf16.mxu0 %v2268_v57  ;;  %2042 = vmatpush3.bf16.msra.mxu1 %v2267_v58  ;;  %v572_v57 = vcombine.high %v564_v53, %v564_v53  ;;  %v580_v58 = vrot.slane %v564_v53, %v2680_v35 }
  0x6a   : > { %2043 = vmatprep.subr.bf16.mxu1 %v2269_v59  ;;  %v2763_v59 = vrot.slane %v557_v54, %v2680_v35 }
  0x6c   : > { %2022 = vmatpush3.bf16.msra.mxu0 %v2270_v60  ;;  %v2325_v60 = vld [vmem:[%s2644_s19 + $0x3f8] sm:$0xff]  }
  0x6d   : > { %2023 = vmatprep.subr.bf16.mxu0 %v2272_v61  ;;  %2044 = vmatpush3.bf16.msra.mxu1 %v2271_v62  ;;  %v594_v61 = vrot.slane %v572_v57, %v2680_v35  ;;  %v2326_v62 = vld [vmem:[%s2644_s19 + $0x338] sm:$0xff]  }
  0x6e   : > { %2045 = vmatprep.subr.bf16.mxu1 %v2273_v63  ;;  %v573_v63 = vcombine.high %v2763_v59, %v2763_v59 }
  0x70   : > { %2024 = vmatpush3.bf16.msra.mxu0 %v2274_v0  ;;  %v602_v0 = vcombine.high %v580_v58, %v580_v58 }
  0x71   : > { %2025 = vmatprep.subr.bf16.mxu0 %v2276_v1  ;;  %2046 = vmatpush3.bf16.msra.mxu1 %v2275_v2  ;;  %v2328_v1 = vld [vmem:[%s2644_s19 + $0x370] sm:$0xff]   ;;  %v604_v2 = vcombine.high %v594_v61, %v594_v61 }
  0x72   : > { %2047 = vmatprep.subr.bf16.mxu1 %v2277_v3  ;;  %v2327_v3 = vld [vmem:[%s2644_s19 + $0x3b8] sm:$0xff]  }
  0x74   : > { %2026 = vmatpush3.bf16.msra.mxu0 %v2278_v4  ;;  %v601_v4 = vrot.slane %v573_v63, %v2680_v35 }
  0x75   : > { %2027 = vmatprep.subr.bf16.mxu0 %v2280_v5  ;;  %2048 = vmatpush3.bf16.msra.mxu1 %v2279_v6  ;;  %v2329_v5 = vld [vmem:[%s2644_s19 + $0x3f0] sm:$0xff]  }
  0x76   : > { %2049 = vmatprep.subr.bf16.mxu1 %v2281_v7  ;;  %v2330_v6 = vld [vmem:[%s2644_s19 + $0x330] sm:$0xff]   ;;  %v605_v7 = vcombine.high %v601_v4, %v601_v4 }
  0x78   : > { %2028 = vmatpush3.bf16.msra.mxu0 %v2282_v8  ;;  %v2332_v8 = vld [vmem:[%s2644_s19 + $0x368] sm:$0xff]  }
  0x79   : > { %2029 = vmatprep.subr.bf16.mxu0 %v2284_v9  ;;  %2050 = vmatpush3.bf16.msra.mxu1 %v2283_v10  ;;  %v2331_v9 = vld [vmem:[%s2644_s19 + $0x3b0] sm:$0xff]   ;;  %v2333_v10 = vld [vmem:[%s2644_s19 + $0x3e8] sm:$0xff]  }
  0x7a   : > { %2051 = vmatprep.subr.bf16.mxu1 %v2285_v11  ;;  %v2334_v11 = vld [vmem:[%s2644_s19 + $0x328] sm:$0xff]  }
  0x7c   : > { %2030 = vmatpush3.bf16.msra.mxu0 %v2286_v12  ;;  %v2336_v12 = vld [vmem:[%s2644_s19 + $0x360] sm:$0xff]  }
  0x7d   : > { %2031 = vmatprep.subr.bf16.mxu0 %v2288_v13  ;;  %2052 = vmatpush3.bf16.msra.mxu1 %v2287_v14  ;;  %v2335_v13 = vld [vmem:[%s2644_s19 + $0x3a8] sm:$0xff]   ;;  %v2337_v14 = vld [vmem:[%s2644_s19 + $0x3e0] sm:$0xff]  }
  0x7e   : > { %2053 = vmatprep.subr.bf16.mxu1 %v2289_v15  ;;  %v2338_v15 = vld [vmem:[%s2644_s19 + $0x320] sm:$0xff]  }
  0x80   : > { %2032 = vmatpush3.bf16.msra.mxu0 %v2290_v16  ;;  %v2340_v16 = vld [vmem:[%s2644_s19 + $0x358] sm:$0xff]  }
  0x81   : > { %2061 = vmatprep.subr.bf16.mxu0 %v2292_v18  ;;  %2054 = vmatpush3.bf16.msra.mxu1 %v2291_v19  ;;  %v2341_v18 = vld [vmem:[%s2644_s19 + $0x3d8] sm:$0xff]  }
  0x82   : > { %2083 = vmatprep.subr.bf16.mxu1 %v2293_v20  ;;  %v2342_v19 = vld [vmem:[%s2644_s19 + $0x318] sm:$0xff]   ;;  %v2344_v20 = vld [vmem:[%s2644_s19 + $0x350] sm:$0xff]  }
  0x83   : > { %1503 = vmatmul.mubr.bf16.vlgmr.msra.gmra.mxu0 %v538_v17  ;;  %v2339_v17 = vld [vmem:[%s2644_s19 + $0x3a0] sm:$0xff]  }
  0x84   : > { %2062 = vmatpush3.bf16.msra.mxu0 %v2294_v21  ;;  %1543 = vmatmul.mubr.bf16.vlgmr.msra.gmra.mxu1 %v554_v22  ;;  %v2343_v21 = vld [vmem:[%s2644_s19 + $0x398] sm:$0xff]   ;;  %v2345_v22 = vld [vmem:[%s2644_s19 + $0x3d0] sm:$0xff]  }
  0x85   : > { %2063 = vmatprep.subr.bf16.mxu0 %v2296_v23  ;;  %2084 = vmatpush3.bf16.msra.mxu1 %v2295_v24  ;;  %v2346_v23 = vld [vmem:[%s2644_s19 + $0x310] sm:$0xff]   ;;  %v2348_v24 = vld [vmem:[%s2644_s19 + $0x348] sm:$0xff]  }
  0x86   : > { %2085 = vmatprep.subr.bf16.mxu1 %v2297_v25  ;;  %1582 = vmatprep.mubr.bf16.mxu0 %v594_v61  ;;  %v2347_v25 = vld [vmem:[%s2644_s19 + $0x390] sm:$0xff]  }
  0x87   : > { %1622 = vmatprep.mubr.bf16.mxu1 %v604_v2 }
  0x88   : > { %2064 = vmatpush3.bf16.msra.mxu0 %v2298_v26  ;;  %v2349_v26 = vld [vmem:[%s2644_s19 + $0x3c8] sm:$0xff]  }
  0x89   : > { %2065 = vmatprep.subr.bf16.mxu0 %v2300_v27  ;;  %2086 = vmatpush3.bf16.msra.mxu1 %v2299_v28  ;;  %v2350_v27 = vld [vmem:[%s2644_s19 + $0x308] sm:$0xff]   ;;  %v2352_v28 = vld [vmem:[%s2644_s19 + $0x340] sm:$0xff]  }
  0x8a   : > { %2087 = vmatprep.subr.bf16.mxu1 %v2301_v29  ;;  %v2351_v29 = vld [vmem:[%s2644_s19 + $0x388] sm:$0xff]  }
  0x8c   : > { %2066 = vmatpush3.bf16.msra.mxu0 %v2302_v30  ;;  %v2353_v30 = vld [vmem:[%s2644_s19 + $0x3c0] sm:$0xff]  }
  0x8d   : > { %2067 = vmatprep.subr.bf16.mxu0 %v2304_v31  ;;  %2088 = vmatpush3.bf16.msra.mxu1 %v2303_v32  ;;  %v2354_v31 = vld [vmem:[%s2644_s19 + $0x300] sm:$0xff]   ;;  %v587_v32 = vrot.slane %v2763_v59, %v2680_v35 }
  0x8e   : > { %2089 = vmatprep.subr.bf16.mxu1 %v2305_v33  ;;  %v2355_v33 = vld [vmem:[%s2644_s19 + $0x380] sm:$0xff]  }
  0x90   : > { %2068 = vmatpush3.bf16.msra.mxu0 %v2306_v34  ;;  %v603_v34 = vcombine.high %v587_v32, %v587_v32 }
  0x91   : > { %2069 = vmatprep.subr.bf16.mxu0 %v2308_v36  ;;  %2090 = vmatpush3.bf16.msra.mxu1 %v2307_v37  ;;  %v2503_v36 = vmov 0.0  }
  0x92   : > { %2091 = vmatprep.subr.bf16.mxu1 %v2309_v38  ;;  %246 = vst [vmem:[#allocation2] sm:$0x1] %v2503_v36 }
  0x94   : > { %2070 = vmatpush3.bf16.msra.mxu0 %v2310_v39 }
  0x95   : > { %2071 = vmatprep.subr.bf16.mxu0 %v2312_v40  ;;  %2092 = vmatpush3.bf16.msra.mxu1 %v2311_v41 }
  0x96   : > { %2093 = vmatprep.subr.bf16.mxu1 %v2313_v42 }
  0x98   : > { %2072 = vmatpush3.bf16.msra.mxu0 %v2314_v43 }
  0x99   : > { %2073 = vmatprep.subr.bf16.mxu0 %v2316_v44  ;;  %2094 = vmatpush3.bf16.msra.mxu1 %v2315_v45 }
  0x9a   : > { %2095 = vmatprep.subr.bf16.mxu1 %v2317_v46 }
  0x9c   : > { %2074 = vmatpush3.bf16.msra.mxu0 %v2318_v47 }
  0x9d   : > { %2075 = vmatprep.subr.bf16.mxu0 %v2320_v48  ;;  %2096 = vmatpush3.bf16.msra.mxu1 %v2319_v49 }
  0x9e   : > { %2097 = vmatprep.subr.bf16.mxu1 %v2321_v50 }
  0xa0   : > { %2076 = vmatpush3.bf16.msra.mxu0 %v2322_v52 }
  0xa1   : > { %2105 = vmatprep.subr.bf16.mxu0 %v2324_v55  ;;  %2098 = vmatpush3.bf16.msra.mxu1 %v2323_v56 }
  0xa2   : > { %2127 = vmatprep.subr.bf16.mxu1 %v2325_v60 }
  0xa3   : > { %1583 = vmatmul.mubr.bf16.vlgmr.msra.gmra.mxu0 %v580_v58 }
  0xa4   : > { %2106 = vmatpush3.bf16.msra.mxu0 %v2326_v62  ;;  %1623 = vmatmul.mubr.bf16.vlgmr.msra.gmra.mxu1 %v602_v0 }
  0xa5   : > { %2107 = vmatprep.subr.bf16.mxu0 %v2328_v1  ;;  %2128 = vmatpush3.bf16.msra.mxu1 %v2327_v3 }
  0xa6   : > { %1662 = vmatprep.mubr.bf16.mxu0 %v601_v4  ;;  %2129 = vmatprep.subr.bf16.mxu1 %v2329_v5 }
  0xa7   : > { %1702 = vmatprep.mubr.bf16.mxu1 %v605_v7 }
  0xa8   : > { %2108 = vmatpush3.bf16.msra.mxu0 %v2330_v6 }
  0xa9   : > { %2109 = vmatprep.subr.bf16.mxu0 %v2332_v8  ;;  %2130 = vmatpush3.bf16.msra.mxu1 %v2331_v9 }
  0xaa   : > { %2131 = vmatprep.subr.bf16.mxu1 %v2333_v10 }
  0xac   : > { %2110 = vmatpush3.bf16.msra.mxu0 %v2334_v11 }
  0xad   : > { %2111 = vmatprep.subr.bf16.mxu0 %v2336_v12  ;;  %2132 = vmatpush3.bf16.msra.mxu1 %v2335_v13 }
  0xae   : > { %2133 = vmatprep.subr.bf16.mxu1 %v2337_v14 }
  0xb0   : > { %2112 = vmatpush3.bf16.msra.mxu0 %v2338_v15  ;;  %v247_v15 = vld [vmem:[#allocation2] sm:$0x1] }
  0xb1   : > { %2113 = vmatprep.subr.bf16.mxu0 %v2340_v16  ;;  %2134 = vmatpush3.bf16.msra.mxu1 %v2339_v17 }
  0xb2   : > { %2135 = vmatprep.subr.bf16.mxu1 %v2341_v18 }
  0xb4   : > { %2114 = vmatpush3.bf16.msra.mxu0 %v2342_v19 }
  0xb5   : > { %2115 = vmatprep.subr.bf16.mxu0 %v2344_v20  ;;  %2136 = vmatpush3.bf16.msra.mxu1 %v2343_v21  ;;  %v1716_v21 = vld [vmem:[%s240_s29] sm:$0x1] }
  0xb6   : > { %2137 = vmatprep.subr.bf16.mxu1 %v2345_v22 }
  0xb8   : > { %2116 = vmatpush3.bf16.msra.mxu0 %v2346_v23 }
  0xb9   : > { %2117 = vmatprep.subr.bf16.mxu0 %v2348_v24  ;;  %2138 = vmatpush3.bf16.msra.mxu1 %v2347_v25 }
  0xba   : > { %2139 = vmatprep.subr.bf16.mxu1 %v2349_v26 }
  0xbc   : > { %2118 = vmatpush3.bf16.msra.mxu0 %v2350_v27 }
  0xbd   : > { %2119 = vmatprep.subr.bf16.mxu0 %v2352_v28  ;;  %2140 = vmatpush3.bf16.msra.mxu1 %v2351_v29 }
  0xbe   : > { %2141 = vmatprep.subr.bf16.mxu1 %v2353_v30 }
  0xc0   : > { %2120 = vmatpush3.bf16.msra.mxu0 %v2354_v31 }
  0xc1   : > { %2142 = vmatpush3.bf16.msra.mxu1 %v2355_v33 }
  0xc3   : > { %1663 = vmatmul.mubr.bf16.vlgmr.msra.gmra.mxu0 %v587_v32 }
  0xc4   : > { %1703 = vmatmul.mubr.bf16.vlgmr.msra.gmra.mxu1 %v603_v34 }
 0x123   : > { %v1989_v37 = vpop.f32.mrf.mxu0 }
 0x124   : > { %v2011_v38 = vpop.f32.mrf.mxu1 }
 0x125   : > { %v1990_v39 = vpop.f32.mrf.mxu0 }
 0x126   : > { %v1991_v40 = vadd.f32 %v1990_v39, %v1989_v37  ;;  %v2012_v41 = vpop.f32.mrf.mxu1 }
 0x127   : > { %v1992_v42 = vpop.f32.mrf.mxu0  ;;  %v2013_v43 = vadd.f32 %v2012_v41, %v2011_v38 }
 0x128   : > { %v2014_v44 = vpop.f32.mrf.mxu1 }
 0x129   : > { %v1993_v45 = vpop.f32.mrf.mxu0  ;;  %v1465_v35 = vadd.f32 %v2013_v43, %v1991_v40 }
 0x12a   : > { %v2015_v46 = vpop.f32.mrf.mxu1 }
 0x143   : > { %v2033_v47 = vpop.f32.mrf.mxu0 }
 0x144   : > { %v2055_v48 = vpop.f32.mrf.mxu1 }
 0x145   : > { %v2034_v49 = vpop.f32.mrf.mxu0 }
 0x146   : > { %v2056_v50 = vpop.f32.mrf.mxu1  ;;  %v2035_v63 = vadd.f32 %v2034_v49, %v2033_v47 }
 0x147   : > { %v2036_v51 = vpop.f32.mrf.mxu0  ;;  %v2057_v1 = vadd.f32 %v2056_v50, %v2055_v48 }
 0x148   : > { %v2058_v52 = vpop.f32.mrf.mxu1  ;;  %v1505_v0 = vadd.f32 %v2035_v63, %v1465_v35 }
 0x149   : > { %v2037_v53 = vpop.f32.mrf.mxu0 }
 0x14a   : > { %v2059_v54 = vpop.f32.mrf.mxu1  ;;  %v1545_v3 = vadd.f32 %v2057_v1, %v1505_v0 }
 0x163   : > { %v2077_v55 = vpop.f32.mrf.mxu0 }
 0x164   : > { %v2099_v56 = vpop.f32.mrf.mxu1 }
 0x165   : > { %v2078_v57 = vpop.f32.mrf.mxu0 }
 0x166   : > { %v2100_v58 = vpop.f32.mrf.mxu1  ;;  %v2079_v2 = vadd.f32 %v2078_v57, %v2077_v55 }
 0x167   : > { %v2080_v59 = vpop.f32.mrf.mxu0  ;;  %v2101_v5 = vadd.f32 %v2100_v58, %v2099_v56 }
 0x168   : > { %v2102_v60 = vpop.f32.mrf.mxu1  ;;  %v1585_v4 = vadd.f32 %v2079_v2, %v1545_v3 }
 0x169   : > { %v2081_v61 = vpop.f32.mrf.mxu0 }
 0x16a   : > { %v2103_v62 = vpop.f32.mrf.mxu1  ;;  %v1625_v9 = vadd.f32 %v2101_v5, %v1585_v4 }
 0x183   : > { %v2121_v6 = vpop.f32.mrf.mxu0 }
 0x184   : > { %v2143_v7 = vpop.f32.mrf.mxu1 }
 0x185   : > { %v2122_v8 = vpop.f32.mrf.mxu0 }
 0x186   : > { %v2123_v10 = vadd.f32 %v2122_v8, %v2121_v6  ;;  %v2144_v11 = vpop.f32.mrf.mxu1 }
 0x187   : > { %v2124_v12 = vpop.f32.mrf.mxu0  ;;  %v2145_v14 = vadd.f32 %v2144_v11, %v2143_v7 }
 0x188   : > { %v1665_v13 = vadd.f32 %v2123_v10, %v1625_v9  ;;  %v2146_v16 = vpop.f32.mrf.mxu1 }
 0x189   : > { %v2125_v17 = vpop.f32.mrf.mxu0 }
 0x18a   : > { %v1705_v18 = vadd.f32 %v2145_v14, %v1665_v13  ;;  %v2147_v19 = vpop.f32.mrf.mxu1 }
 0x18c   : > { %v1710_v20 = vadd.f32 %v1705_v18, %v247_v15 }
 0x18e   : > { %1711 = vst [vmem:[#allocation2] sm:$0x1] %v1710_v20 }
 0x195   : > { %v1715_v22 = vld [vmem:[#allocation2] sm:$0x1] }
 0x196   : > { %v1717_v23 = vadd.f32 %v1716_v21, %v1715_v22 }
 0x198   : > { %v1718_v24 = vmax.f32 %v1717_v23, 0.0 }
 0x19a   : > { %1719 = vst [vmem:[%s235_s27] sm:$0x1] %v1718_v24 }
 0x19b   : > { %2424 = shalt.err (!%p2421_p0)
}
 0x19c   : > { %s2425_s5 = scalar_lea.hbm %s1731_s8, 16  ;;  %s2429_s19 = scalar_lea.hbm %s2851_s3, 32 }
 0x19d   : > { %p2426_p2 = scmp.ne.s32.totalorder %s1731_s8, %s2425_s5  ;;  %p2430_p11 = scmp.lt.s32.totalorder %s1731_s8, %s2851_s3 }
 0x19e   : > { %p2431_p4 = scmp.lt.s32.totalorder %s2429_s19, %s2425_s5 }
 0x19f   : > { %p2427_p6 = pnand %p2426_p2, %p2865_p5 }
 0x1a0   : > { %p2432_p3 = por %p2431_p4, %p2430_p11 }
 0x1a1   : > { %p2428_p10 = pneg %p2427_p6 }
 0x1a3   : > { %p2433_p13 = pnand %p2432_p3, %p2428_p10 }
 0x1a5   : > { %2436 = shalt.err (!%p2433_p13)
}
 0x1a6   : > { %2155 = dma.vmem_to_hbm [thread:$0]  (%p2865_p5), %s1734_s30, 16, %s1731_s8, %s1721_s10  }
 0x1a7 PF: > { %s1745_s26 = sand.u32 1, %s2475_s12   ;;  %p2866_p1 = scmp.ne.s32.totalorder %s2859_s25, 0 }
 0x1a8   : > { %p2867_p12 = scmp.ge.s32.totalorder %s2495_s17, 2  ;;  %s1746_s29 = scalar_lea.sflag [#allocation5], %s1745_s26 }
 0x1aa   : > { %p2166_p7 = pnand %p2867_p12, %p2866_p1 }
 0x1ac   : > { %p2167_p8 = pneg %p2166_p7 }
 0x1ae   : > { %2470 = dma.done.wait (%p2167_p8), %s1746_s29, 16  }
 0x1af   : > { %2472 = vsyncadd (%p2167_p8), %s1746_s29, 4294967280  ;;  %s20_s17 = sadd.s32 1, %s2495_s17   ;;  %s2868_s12 = smov %s2479_s13 }
 0x1b0   : > { %p17_p9 = scmp.ge.s32.totalorder %s20_s17, 4   ;;  %s2869_s13 = smov %s2483_s14 }
 0x1b1   : > { %s2870_s14 = smov %s2627_s6  ;;  %s2871_s15 = smov %s2491_s16 }
 0x1b2   : > { %s2872_s16 = smov %s2874_s4  ;;  %19 = sbr.rel (!%p17_p9) target bundleno = 9 (0x9), region = 94 }
 0x1b7   :  { %1750 = vsyncpa [#allocation4], 1 }
 0x1b8   :  { %1752 = vsyncpa [#allocation4 + $0x1], 1 }
 0x1b9   :  { %1753 = vsyncpa [#allocation7], 1 }
 0x1ba   :  { %1755 = vsyncpa [#allocation7 + $0x1], 1 }
 0x1bb   :  { %1756 = vsyncpa [#allocation5], 1 }
 0x1bc   :  { %1758 = vsyncpa [#allocation5 + $0x1], 1 }

</bundles_post_ra>
